<compile_context>
chip_gen: v5e
topology: v5e:2x2
jax: 0.10.0
libtpu: 0.0.40
codegen_flags: <defaults>
</compile_context>

<pallas_src>
import functools

import jax
import jax.numpy as jnp
from jax.experimental import pallas as pl
from jax.experimental.pallas import tpu as pltpu

VMEM = pltpu.MemorySpace.VMEM
NEG_INF = -1e9  # additive mask stays f32, so -1e9 is safe (exp underflows to 0)


# ------------------------------ fused kernel -------------------------------- #

def _fused_multilayer_kernel(x_ref, a_ref, w_ref, p_ref, o_ref, *, num_heads, eps):
    """Whole MultiLayer forward on VMEM-resident operands.

    x_ref : [N, D+1] f32  node features (lanes 0:D) + graph id column (lane D)
    a_ref : [N, N]   bf16 GCN-normalized dense adjacency D^-1/2 (A+I) D^-1/2
    w_ref : [4D, 4D] bf16 packed weights:
              rows 0:D          = [gcn_w | Wq | Wk | Wv]
              rows D:2D         = [out_proj_w (0:D) | ff_w1 (D:3D) | pad]
              rows 2D:4D        = [ff_w2 (0:D) | pad]
    p_ref : [8, 4D]  f32 packed scalars (one vreg):
              row 0 = [gcn_b | q_b | k_b | v_b]
              row 1 = [out_proj_b | ff_b1 | ff_b2]
              row 2 = [bn_local_g | bn_local_b | bn_attn_g | bn_attn_b]
              row 3 = [bn2_g | bn2_b | pad]
              row 4 = batch ids as f32 in lanes 0:N
    o_ref : [N, D]   f32 output node features
    """
    N, D = o_ref.shape
    Dh = D // num_heads

    x = x_ref[:, :D]                       # [N, D] f32
    b_row = x_ref[:, D:D + 1]              # [N, 1] graph id per node
    p = p_ref[...]                         # [8, 4D] loaded once (single vreg)
    b_col = p[4:5, :N]                     # [1, N] graph ids (row layout)

    def batchnorm(y, gamma, beta):
        # BatchNorm1d, training-mode batch statistics, biased variance.
        # Single-pass stats: var = E[y^2] - E[y]^2 (halves the serial reductions).
        mean = jnp.mean(y, axis=0, keepdims=True)
        var = jnp.mean(y * y, axis=0, keepdims=True) - mean * mean
        return (y - mean) * jax.lax.rsqrt(var + eps) * gamma + beta

    # One lane-dense bf16 MXU pass feeds both branches: x @ [gcn_w | Wq | Wk | Wv].
    x_bf = x.astype(jnp.bfloat16)
    xw_all = jnp.dot(x_bf, w_ref[0:D, :],
                     preferred_element_type=jnp.float32)            # [N, 4D] f32
    bias_all = p[0:1, :]                                             # [1, 4D]

    # ---------------- LocalModel: GCN -> residual -> BatchNorm ----------------
    # GCNConv adds its bias AFTER aggregation: A_norm @ (X W) + b.
    h_gcn = jnp.dot(a_ref[...], xw_all[:, :D].astype(jnp.bfloat16),
                    preferred_element_type=jnp.float32) + bias_all[:, :D]
    h_local = batchnorm(h_gcn + x, p[2:3, 0:D], p[2:3, D:2 * D])

    # ------------- GlobalModel: MHA -> residual -> BatchNorm ------------------
    # Block-diagonal additive mask built in-kernel from batch ids (VPU compare):
    # exactly equivalent to to_dense_batch + key_padding_mask for disjoint graphs.
    mask = jnp.where(b_row == b_col,
                     jnp.float32(0.0), jnp.float32(NEG_INF))         # [N, N] f32

    qkv = xw_all[:, D:] + bias_all[:, D:]                            # [N, 3D] f32
    q = (qkv[:, :D] * (1.0 / (Dh ** 0.5))).astype(jnp.bfloat16)
    k = qkv[:, D:2 * D].astype(jnp.bfloat16)
    v = qkv[:, 2 * D:].astype(jnp.bfloat16)

    # Per-head scores (independent 2-D bf16 MXU dots) ...
    scores = [
        jax.lax.dot_general(q[:, h * Dh:(h + 1) * Dh], k[:, h * Dh:(h + 1) * Dh],
                            (((1,), (1,)), ((), ())),
                            preferred_element_type=jnp.float32)
        for h in range(num_heads)]
    # ... then ONE batched softmax over the [H, N, N] slab (mask add stays f32).
    s = jnp.stack(scores, axis=0) + mask
    s_max = jnp.max(s, axis=-1, keepdims=True)
    pr = jnp.exp(s - s_max)
    pr = pr * pl.reciprocal(jnp.sum(pr, axis=-1, keepdims=True), approx=True)
    pr = pr.astype(jnp.bfloat16)

    # Per-head P@V, lane-concat the head outputs, then ONE K=D out_proj matmul.
    heads = [jnp.dot(pr[h], v[:, h * Dh:(h + 1) * Dh],
                     preferred_element_type=jnp.float32)
             for h in range(num_heads)]
    attn_cat = jnp.concatenate(heads, axis=1).astype(jnp.bfloat16)   # [N, D]
    attn = jnp.dot(attn_cat, w_ref[D:2 * D, 0:D],
                   preferred_element_type=jnp.float32) + p[1:2, 0:D]
    h_attn = batchnorm(attn + x, p[2:3, 2 * D:3 * D], p[2:3, 3 * D:4 * D])

    # ------------- MultiLayer: sum branches -> FF -> BatchNorm ----------------
    h = h_local + h_attn
    ff1 = jnp.maximum(
        jnp.dot(h.astype(jnp.bfloat16), w_ref[D:2 * D, D:3 * D],
                preferred_element_type=jnp.float32) + p[1:2, D:3 * D],
        0.0)
    ff2 = jnp.dot(ff1.astype(jnp.bfloat16), w_ref[2 * D:4 * D, 0:D],
                  preferred_element_type=jnp.float32) + p[1:2, 3 * D:4 * D]
    o_ref[...] = batchnorm(h + ff2, p[3:4, 0:D], p[3:4, D:2 * D])
    # TODO(synk): Dropout layers omitted (p = 0.0 => identity in this config);
    # eval-mode running-stat BatchNorm and a gridded flash-style variant for
    # large N (O(N^2) adjacency/score tiling, 'parallel' row axis for v7x's
    # 2 TensorCores, explicit vmem_limit_bytes) are not implemented here.


# ------------------------------ parameters ---------------------------------- #

def init_params(key, dim_h):
    ks = jax.random.split(key, 10)

    def w(k, shape, scale=0.1):
        return (jax.random.normal(k, shape) * scale).astype(jnp.float32)

    D = dim_h
    return {
        # LocalModel: GCNConv (weight, bias) + BatchNorm1d
        "gcn_w": w(ks[0], (D, D)),
        "gcn_b": w(ks[1], (D,)),
        "bn_local_g": jnp.ones((D,), jnp.float32),
        "bn_local_b": jnp.zeros((D,), jnp.float32),
        # GlobalModel: MultiheadAttention (in_proj, out_proj) + BatchNorm1d
        # NOTE: weights stored [in, out] and applied as x @ W (real torch
        # checkpoints store [out, in] and must be transposed before packing).
        "in_proj_w": w(ks[2], (D, 3 * D)),
        "in_proj_b": w(ks[3], (3 * D,)),
        "out_proj_w": w(ks[4], (D, D)),
        "out_proj_b": w(ks[5], (D,)),
        "bn_attn_g": jnp.ones((D,), jnp.float32),
        "bn_attn_b": jnp.zeros((D,), jnp.float32),
        # MultiLayer FF block + BatchNorm1d
        "ff_w1": w(ks[6], (D, 2 * D)),
        "ff_b1": w(ks[7], (2 * D,)),
        "ff_w2": w(ks[8], (2 * D, D)),
        "ff_b2": w(ks[9], (D,)),
        "bn2_g": jnp.ones((D,), jnp.float32),
        "bn2_b": jnp.zeros((D,), jnp.float32),
    }


# -------------------------------- forward ------------------------------------ #

def multilayer_forward(params, x, edge_index, batch_idx, *, num_heads):
    N, D = x.shape
    assert N <= 4 * D, "batch-id row of the param slab assumes N <= 4*dim_h"

    # -- graph glue (plain JAX, runs once per call) -----------------------------
    # GCN-normalized dense adjacency with self-loops (bf16 for the MXU / DMA).
    src, dst = edge_index[0], edge_index[1]
    adj = jnp.zeros((N, N), jnp.float32).at[dst, src].add(1.0)
    adj = adj + jnp.eye(N, dtype=jnp.float32)
    dinv = jax.lax.rsqrt(jnp.sum(adj, axis=1))
    a_norm = (adj * dinv[:, None] * dinv[None, :]).astype(jnp.bfloat16)
    # TODO(synk): at realistic graph sizes this dense [N,N] adjacency (and the
    # in-kernel [H,N,N] scores) must be tiled with a BlockSpec grid + online
    # softmax; at N=14 everything fits in one VMEM-resident kernel.

    bidx_f = batch_idx.astype(jnp.float32)

    # x with the graph-id column appended (removes the O(N^2) mask input).
    x_ext = jnp.concatenate([x, bidx_f[:, None]], axis=1)            # [N, D+1]

    # Packed bf16 weight slab [4D, 4D].
    zD = jnp.zeros((D, D), jnp.float32)
    w_slab = jnp.concatenate([
        jnp.concatenate([params["gcn_w"], params["in_proj_w"]], axis=1),          # [D, 4D]
        jnp.concatenate([params["out_proj_w"], params["ff_w1"], zD], axis=1),     # [D, 4D]
        jnp.concatenate([params["ff_w2"], jnp.zeros((2 * D, 3 * D))], axis=1),    # [2D,4D]
    ], axis=0).astype(jnp.bfloat16)                                               # [4D,4D]

    # Packed f32 bias / BN / batch-id slab [8, 4D] (exactly one vreg in-kernel).
    p0 = jnp.concatenate([params["gcn_b"], params["in_proj_b"]])
    p1 = jnp.concatenate([params["out_proj_b"], params["ff_b1"], params["ff_b2"]])
    p2 = jnp.concatenate([params["bn_local_g"], params["bn_local_b"],
                          params["bn_attn_g"], params["bn_attn_b"]])
    p3 = jnp.concatenate([params["bn2_g"], params["bn2_b"],
                          jnp.zeros((2 * D,), jnp.float32)])
    p4 = jnp.zeros((4 * D,), jnp.float32).at[:N].set(bidx_f)
    zrow = jnp.zeros((4 * D,), jnp.float32)
    p_slab = jnp.stack([p0, p1, p2, p3, p4, zrow, zrow, zrow],
                       axis=0).astype(jnp.float32)                               # [8, 4D]

    # Advisory cost hint so XLA schedules the call vs. the wrapper-side scatter.
    flops = 2 * N * D * (9 * D) + 6 * N * N * D
    transcendentals = num_heads * N * N + num_heads * N + 3 * D
    bytes_accessed = (x_ext.size * 4 + a_norm.size * 2 + w_slab.size * 2
                      + p_slab.size * 4 + N * D * 4)
    cost = pl.CostEstimate(flops=flops, transcendentals=transcendentals,
                           bytes_accessed=bytes_accessed)

    kernel = functools.partial(_fused_multilayer_kernel,
                               num_heads=num_heads, eps=1e-5)
    return pl.pallas_call(
        kernel,
        out_shape=jax.ShapeDtypeStruct((N, D), jnp.float32),
        in_specs=[pl.BlockSpec(memory_space=VMEM)] * 4,
        out_specs=pl.BlockSpec(memory_space=VMEM),
        cost_estimate=cost,
    )(x_ext, a_norm, w_slab, p_slab)


# ---------------------------------- main ------------------------------------- #

if __name__ == "__main__":
    dim_h = 32
    num_heads = 4
    graph_sizes = [6, 8]                       # 2 graphs, 14 nodes total
    N = sum(graph_sizes)

    # batch vector (host-side, static)
    batch_list = []
    for g, sz in enumerate(graph_sizes):
        batch_list += [g] * sz
    batch_idx = jnp.array(batch_list, dtype=jnp.int32)

    # deterministic undirected ring edges within each graph
    edges = []
    offset = 0
    for sz in graph_sizes:
        for i in range(sz):
            a = offset + i
            b = offset + (i + 1) % sz
            edges.append((a, b))
            edges.append((b, a))
        offset += sz
    edge_index = jnp.array(edges, dtype=jnp.int32).T   # [2, E]

    key = jax.random.PRNGKey(0)
    k_x, k_p = jax.random.split(key)
    x = jax.random.normal(k_x, (N, dim_h), dtype=jnp.float32)
    params = init_params(k_p, dim_h)

    fwd = jax.jit(functools.partial(multilayer_forward, num_heads=num_heads))
    out = fwd(params, x, edge_index, batch_idx)
    out = jax.block_until_ready(out)

    assert out.shape == (N, dim_h)
    assert bool(jnp.all(jnp.isfinite(out)))
    print("KERNEL_OK")
</pallas_src>

<mosaic_0001>
module attributes {stable_mosaic.version = 11 : i64} {
  func.func @_fused_multilayer_kernel(%arg0: memref<14x33xf32, #tpu.memory_space<vmem>>, %arg1: memref<14x14xbf16, #tpu.memory_space<vmem>>, %arg2: memref<128x128xbf16, #tpu.memory_space<vmem>>, %arg3: memref<8x128xf32, #tpu.memory_space<vmem>>, %arg4: memref<14x32xf32, #tpu.memory_space<vmem>>) attributes {dimension_semantics = [], scalar_prefetch = 0 : i64, scratch_operands = 0 : i64, tpu.core_type = #tpu.core_type<tc>} {
    %c0 = arith.constant 0 : index
    %c0_0 = arith.constant 0 : index
    %0 = vector.load %arg0[%c0, %c0_0] : memref<14x33xf32, #tpu.memory_space<vmem>>, vector<14x32xf32>
    %c0_1 = arith.constant 0 : index
    %c32 = arith.constant 32 : index
    %1 = vector.load %arg0[%c0_1, %c32] : memref<14x33xf32, #tpu.memory_space<vmem>>, vector<14x1xf32>
    %c0_2 = arith.constant 0 : index
    %c0_3 = arith.constant 0 : index
    %2 = vector.load %arg3[%c0_2, %c0_3] : memref<8x128xf32, #tpu.memory_space<vmem>>, vector<8x128xf32>
    %3 = vector.extract_strided_slice %2 {offsets = [4, 0], sizes = [1, 14], strides = [1, 1]} : vector<8x128xf32> to vector<1x14xf32>
    %4 = arith.truncf %0 : vector<14x32xf32> to vector<14x32xbf16>
    %c0_4 = arith.constant 0 : index
    %c0_5 = arith.constant 0 : index
    %5 = vector.load %arg2[%c0_4, %c0_5] : memref<128x128xbf16, #tpu.memory_space<vmem>>, vector<32x128xbf16>
    %cst = arith.constant dense<0.000000e+00> : vector<14x128xf32>
    %6 = tpu.matmul %4, %5, %cst {dimension_numbers = #tpu.dot_dimension_numbers<[1], [0], [0], [1], [0, 0, 1, 1], [], []>} : vector<14x32xbf16>, vector<32x128xbf16>, vector<14x128xf32> -> vector<14x128xf32>
    %7 = vector.extract_strided_slice %2 {offsets = [0, 0], sizes = [1, 128], strides = [1, 1]} : vector<8x128xf32> to vector<1x128xf32>
    %c0_6 = arith.constant 0 : index
    %c0_7 = arith.constant 0 : index
    %8 = vector.load %arg1[%c0_6, %c0_7] : memref<14x14xbf16, #tpu.memory_space<vmem>>, vector<14x14xbf16>
    %9 = vector.extract_strided_slice %6 {offsets = [0, 0], sizes = [14, 32], strides = [1, 1]} : vector<14x128xf32> to vector<14x32xf32>
    %10 = arith.truncf %9 : vector<14x32xf32> to vector<14x32xbf16>
    %cst_8 = arith.constant dense<0.000000e+00> : vector<14x32xf32>
    %11 = tpu.matmul %8, %10, %cst_8 {dimension_numbers = #tpu.dot_dimension_numbers<[1], [0], [0], [1], [0, 0, 1, 1], [], []>} : vector<14x14xbf16>, vector<14x32xbf16>, vector<14x32xf32> -> vector<14x32xf32>
    %12 = vector.extract_strided_slice %7 {offsets = [0, 0], sizes = [1, 32], strides = [1, 1]} : vector<1x128xf32> to vector<1x32xf32>
    %13 = vector.broadcast %12 : vector<1x32xf32> to vector<14x32xf32>
    %14 = arith.addf %11, %13 : vector<14x32xf32>
    %15 = arith.addf %14, %0 : vector<14x32xf32>
    %16 = vector.extract_strided_slice %2 {offsets = [2, 0], sizes = [1, 32], strides = [1, 1]} : vector<8x128xf32> to vector<1x32xf32>
    %17 = vector.extract_strided_slice %2 {offsets = [2, 32], sizes = [1, 32], strides = [1, 1]} : vector<8x128xf32> to vector<1x32xf32>
    %cst_9 = arith.constant dense<0.000000e+00> : vector<32xf32>
    %18 = vector.multi_reduction <add>, %15, %cst_9 [0] : vector<14x32xf32> to vector<32xf32>
    %19 = vector.shape_cast %18 : vector<32xf32> to vector<1x32xf32>
    %cst_10 = arith.constant 1.400000e+01 : f32
    %20 = vector.broadcast %cst_10 : f32 to vector<1x32xf32>
    %21 = arith.divf %19, %20 : vector<1x32xf32>
    %22 = arith.mulf %15, %15 : vector<14x32xf32>
    %cst_11 = arith.constant dense<0.000000e+00> : vector<32xf32>
    %23 = vector.multi_reduction <add>, %22, %cst_11 [0] : vector<14x32xf32> to vector<32xf32>
    %24 = vector.shape_cast %23 : vector<32xf32> to vector<1x32xf32>
    %cst_12 = arith.constant 1.400000e+01 : f32
    %25 = vector.broadcast %cst_12 : f32 to vector<1x32xf32>
    %26 = arith.divf %24, %25 : vector<1x32xf32>
    %27 = arith.mulf %21, %21 : vector<1x32xf32>
    %28 = arith.subf %26, %27 : vector<1x32xf32>
    %29 = vector.broadcast %21 : vector<1x32xf32> to vector<14x32xf32>
    %30 = arith.subf %15, %29 : vector<14x32xf32>
    %cst_13 = arith.constant 9.99999974E-6 : f32
    %31 = vector.broadcast %cst_13 : f32 to vector<1x32xf32>
    %32 = arith.addf %28, %31 : vector<1x32xf32>
    %33 = math.rsqrt %32 : vector<1x32xf32>
    %34 = vector.broadcast %33 : vector<1x32xf32> to vector<14x32xf32>
    %35 = arith.mulf %30, %34 : vector<14x32xf32>
    %36 = vector.broadcast %16 : vector<1x32xf32> to vector<14x32xf32>
    %37 = arith.mulf %35, %36 : vector<14x32xf32>
    %38 = vector.broadcast %17 : vector<1x32xf32> to vector<14x32xf32>
    %39 = arith.addf %37, %38 : vector<14x32xf32>
    %40 = vector.broadcast %1 : vector<14x1xf32> to vector<14x14xf32>
    %41 = vector.broadcast %3 : vector<1x14xf32> to vector<14x14xf32>
    %42 = arith.cmpf oeq, %40, %41 : vector<14x14xf32>
    %cst_14 = arith.constant 0.000000e+00 : f32
    %cst_15 = arith.constant -1.000000e+09 : f32
    %43 = vector.broadcast %cst_14 : f32 to vector<14x14xf32>
    %44 = vector.broadcast %cst_15 : f32 to vector<14x14xf32>
    %45 = arith.select %42, %43, %44 : vector<14x14xi1>, vector<14x14xf32>
    %46 = vector.extract_strided_slice %6 {offsets = [0, 32], sizes = [14, 96], strides = [1, 1]} : vector<14x128xf32> to vector<14x96xf32>
    %47 = vector.extract_strided_slice %7 {offsets = [0, 32], sizes = [1, 96], strides = [1, 1]} : vector<1x128xf32> to vector<1x96xf32>
    %48 = vector.broadcast %47 : vector<1x96xf32> to vector<14x96xf32>
    %49 = arith.addf %46, %48 : vector<14x96xf32>
    %50 = vector.extract_strided_slice %49 {offsets = [0, 0], sizes = [14, 32], strides = [1, 1]} : vector<14x96xf32> to vector<14x32xf32>
    %cst_16 = arith.constant 0.353553385 : f32
    %51 = vector.broadcast %cst_16 : f32 to vector<14x32xf32>
    %52 = arith.mulf %50, %51 : vector<14x32xf32>
    %53 = arith.truncf %52 : vector<14x32xf32> to vector<14x32xbf16>
    %54 = vector.extract_strided_slice %49 {offsets = [0, 32], sizes = [14, 32], strides = [1, 1]} : vector<14x96xf32> to vector<14x32xf32>
    %55 = arith.truncf %54 : vector<14x32xf32> to vector<14x32xbf16>
    %56 = vector.extract_strided_slice %49 {offsets = [0, 64], sizes = [14, 32], strides = [1, 1]} : vector<14x96xf32> to vector<14x32xf32>
    %57 = arith.truncf %56 : vector<14x32xf32> to vector<14x32xbf16>
    %58 = vector.extract_strided_slice %53 {offsets = [0, 0], sizes = [14, 8], strides = [1, 1]} : vector<14x32xbf16> to vector<14x8xbf16>
    %59 = vector.extract_strided_slice %55 {offsets = [0, 0], sizes = [14, 8], strides = [1, 1]} : vector<14x32xbf16> to vector<14x8xbf16>
    %cst_17 = arith.constant dense<0.000000e+00> : vector<14x14xf32>
    %60 = tpu.matmul %58, %59, %cst_17 {dimension_numbers = #tpu.dot_dimension_numbers<[1], [1], [0], [0], [0, 0, 1, 0], [], []>} : vector<14x8xbf16>, vector<14x8xbf16>, vector<14x14xf32> -> vector<14x14xf32>
    %61 = vector.extract_strided_slice %53 {offsets = [0, 8], sizes = [14, 8], strides = [1, 1]} : vector<14x32xbf16> to vector<14x8xbf16>
    %62 = vector.extract_strided_slice %55 {offsets = [0, 8], sizes = [14, 8], strides = [1, 1]} : vector<14x32xbf16> to vector<14x8xbf16>
    %cst_18 = arith.constant dense<0.000000e+00> : vector<14x14xf32>
    %63 = tpu.matmul %61, %62, %cst_18 {dimension_numbers = #tpu.dot_dimension_numbers<[1], [1], [0], [0], [0, 0, 1, 0], [], []>} : vector<14x8xbf16>, vector<14x8xbf16>, vector<14x14xf32> -> vector<14x14xf32>
    %64 = vector.extract_strided_slice %53 {offsets = [0, 16], sizes = [14, 8], strides = [1, 1]} : vector<14x32xbf16> to vector<14x8xbf16>
    %65 = vector.extract_strided_slice %55 {offsets = [0, 16], sizes = [14, 8], strides = [1, 1]} : vector<14x32xbf16> to vector<14x8xbf16>
    %cst_19 = arith.constant dense<0.000000e+00> : vector<14x14xf32>
    %66 = tpu.matmul %64, %65, %cst_19 {dimension_numbers = #tpu.dot_dimension_numbers<[1], [1], [0], [0], [0, 0, 1, 0], [], []>} : vector<14x8xbf16>, vector<14x8xbf16>, vector<14x14xf32> -> vector<14x14xf32>
    %67 = vector.extract_strided_slice %53 {offsets = [0, 24], sizes = [14, 8], strides = [1, 1]} : vector<14x32xbf16> to vector<14x8xbf16>
    %68 = vector.extract_strided_slice %55 {offsets = [0, 24], sizes = [14, 8], strides = [1, 1]} : vector<14x32xbf16> to vector<14x8xbf16>
    %cst_20 = arith.constant dense<0.000000e+00> : vector<14x14xf32>
    %69 = tpu.matmul %67, %68, %cst_20 {dimension_numbers = #tpu.dot_dimension_numbers<[1], [1], [0], [0], [0, 0, 1, 0], [], []>} : vector<14x8xbf16>, vector<14x8xbf16>, vector<14x14xf32> -> vector<14x14xf32>
    %70 = vector.shape_cast %60 : vector<14x14xf32> to vector<1x14x14xf32>
    %71 = vector.shape_cast %63 : vector<14x14xf32> to vector<1x14x14xf32>
    %72 = vector.shape_cast %66 : vector<14x14xf32> to vector<1x14x14xf32>
    %73 = vector.shape_cast %69 : vector<14x14xf32> to vector<1x14x14xf32>
    %74 = tpu.concatenate %70, %71, %72, %73 in 0 : vector<1x14x14xf32>, vector<1x14x14xf32>, vector<1x14x14xf32>, vector<1x14x14xf32> -> vector<4x14x14xf32>
    %75 = vector.shape_cast %45 : vector<14x14xf32> to vector<1x14x14xf32>
    %76 = vector.broadcast %75 : vector<1x14x14xf32> to vector<4x14x14xf32>
    %77 = arith.addf %74, %76 : vector<4x14x14xf32>
    %cst_21 = arith.constant dense<0xFF800000> : vector<4x14xf32>
    %78 = vector.multi_reduction <maximumf>, %77, %cst_21 [2] : vector<4x14x14xf32> to vector<4x14xf32>
    %79 = vector.shape_cast %78 : vector<4x14xf32> to vector<4x14x1xf32>
    %80 = vector.broadcast %79 : vector<4x14x1xf32> to vector<4x14x14xf32>
    %81 = arith.subf %77, %80 : vector<4x14x14xf32>
    %82 = math.exp %81 : vector<4x14x14xf32>
    %cst_22 = arith.constant dense<0.000000e+00> : vector<4x14xf32>
    %83 = vector.multi_reduction <add>, %82, %cst_22 [2] : vector<4x14x14xf32> to vector<4x14xf32>
    %84 = vector.shape_cast %83 : vector<4x14xf32> to vector<4x14x1xf32>
    %85 = tpu.reciprocal %84 {approx = true} : vector<4x14x1xf32> -> vector<4x14x1xf32>
    %86 = vector.broadcast %85 : vector<4x14x1xf32> to vector<4x14x14xf32>
    %87 = arith.mulf %82, %86 : vector<4x14x14xf32>
    %88 = arith.truncf %87 : vector<4x14x14xf32> to vector<4x14x14xbf16>
    %89 = vector.extract_strided_slice %88 {offsets = [0, 0, 0], sizes = [1, 14, 14], strides = [1, 1, 1]} : vector<4x14x14xbf16> to vector<1x14x14xbf16>
    %90 = vector.shape_cast %89 : vector<1x14x14xbf16> to vector<14x14xbf16>
    %91 = vector.extract_strided_slice %57 {offsets = [0, 0], sizes = [14, 8], strides = [1, 1]} : vector<14x32xbf16> to vector<14x8xbf16>
    %cst_23 = arith.constant dense<0.000000e+00> : vector<14x8xf32>
    %92 = tpu.matmul %90, %91, %cst_23 {dimension_numbers = #tpu.dot_dimension_numbers<[1], [0], [0], [1], [0, 0, 1, 1], [], []>} : vector<14x14xbf16>, vector<14x8xbf16>, vector<14x8xf32> -> vector<14x8xf32>
    %93 = vector.extract_strided_slice %88 {offsets = [1, 0, 0], sizes = [1, 14, 14], strides = [1, 1, 1]} : vector<4x14x14xbf16> to vector<1x14x14xbf16>
    %94 = vector.shape_cast %93 : vector<1x14x14xbf16> to vector<14x14xbf16>
    %95 = vector.extract_strided_slice %57 {offsets = [0, 8], sizes = [14, 8], strides = [1, 1]} : vector<14x32xbf16> to vector<14x8xbf16>
    %cst_24 = arith.constant dense<0.000000e+00> : vector<14x8xf32>
    %96 = tpu.matmul %94, %95, %cst_24 {dimension_numbers = #tpu.dot_dimension_numbers<[1], [0], [0], [1], [0, 0, 1, 1], [], []>} : vector<14x14xbf16>, vector<14x8xbf16>, vector<14x8xf32> -> vector<14x8xf32>
    %97 = vector.extract_strided_slice %88 {offsets = [2, 0, 0], sizes = [1, 14, 14], strides = [1, 1, 1]} : vector<4x14x14xbf16> to vector<1x14x14xbf16>
    %98 = vector.shape_cast %97 : vector<1x14x14xbf16> to vector<14x14xbf16>
    %99 = vector.extract_strided_slice %57 {offsets = [0, 16], sizes = [14, 8], strides = [1, 1]} : vector<14x32xbf16> to vector<14x8xbf16>
    %cst_25 = arith.constant dense<0.000000e+00> : vector<14x8xf32>
    %100 = tpu.matmul %98, %99, %cst_25 {dimension_numbers = #tpu.dot_dimension_numbers<[1], [0], [0], [1], [0, 0, 1, 1], [], []>} : vector<14x14xbf16>, vector<14x8xbf16>, vector<14x8xf32> -> vector<14x8xf32>
    %101 = vector.extract_strided_slice %88 {offsets = [3, 0, 0], sizes = [1, 14, 14], strides = [1, 1, 1]} : vector<4x14x14xbf16> to vector<1x14x14xbf16>
    %102 = vector.shape_cast %101 : vector<1x14x14xbf16> to vector<14x14xbf16>
    %103 = vector.extract_strided_slice %57 {offsets = [0, 24], sizes = [14, 8], strides = [1, 1]} : vector<14x32xbf16> to vector<14x8xbf16>
    %cst_26 = arith.constant dense<0.000000e+00> : vector<14x8xf32>
    %104 = tpu.matmul %102, %103, %cst_26 {dimension_numbers = #tpu.dot_dimension_numbers<[1], [0], [0], [1], [0, 0, 1, 1], [], []>} : vector<14x14xbf16>, vector<14x8xbf16>, vector<14x8xf32> -> vector<14x8xf32>
    %105 = tpu.concatenate %92, %96, %100, %104 in 1 : vector<14x8xf32>, vector<14x8xf32>, vector<14x8xf32>, vector<14x8xf32> -> vector<14x32xf32>
    %106 = arith.truncf %105 : vector<14x32xf32> to vector<14x32xbf16>
    %c32_27 = arith.constant 32 : index
    %c0_28 = arith.constant 0 : index
    %107 = vector.load %arg2[%c32_27, %c0_28] : memref<128x128xbf16, #tpu.memory_space<vmem>>, vector<32x32xbf16>
    %cst_29 = arith.constant dense<0.000000e+00> : vector<14x32xf32>
    %108 = tpu.matmul %106, %107, %cst_29 {dimension_numbers = #tpu.dot_dimension_numbers<[1], [0], [0], [1], [0, 0, 1, 1], [], []>} : vector<14x32xbf16>, vector<32x32xbf16>, vector<14x32xf32> -> vector<14x32xf32>
    %109 = vector.extract_strided_slice %2 {offsets = [1, 0], sizes = [1, 32], strides = [1, 1]} : vector<8x128xf32> to vector<1x32xf32>
    %110 = vector.broadcast %109 : vector<1x32xf32> to vector<14x32xf32>
    %111 = arith.addf %108, %110 : vector<14x32xf32>
    %112 = arith.addf %111, %0 : vector<14x32xf32>
    %113 = vector.extract_strided_slice %2 {offsets = [2, 64], sizes = [1, 32], strides = [1, 1]} : vector<8x128xf32> to vector<1x32xf32>
    %114 = vector.extract_strided_slice %2 {offsets = [2, 96], sizes = [1, 32], strides = [1, 1]} : vector<8x128xf32> to vector<1x32xf32>
    %cst_30 = arith.constant dense<0.000000e+00> : vector<32xf32>
    %115 = vector.multi_reduction <add>, %112, %cst_30 [0] : vector<14x32xf32> to vector<32xf32>
    %116 = vector.shape_cast %115 : vector<32xf32> to vector<1x32xf32>
    %cst_31 = arith.constant 1.400000e+01 : f32
    %117 = vector.broadcast %cst_31 : f32 to vector<1x32xf32>
    %118 = arith.divf %116, %117 : vector<1x32xf32>
    %119 = arith.mulf %112, %112 : vector<14x32xf32>
    %cst_32 = arith.constant dense<0.000000e+00> : vector<32xf32>
    %120 = vector.multi_reduction <add>, %119, %cst_32 [0] : vector<14x32xf32> to vector<32xf32>
    %121 = vector.shape_cast %120 : vector<32xf32> to vector<1x32xf32>
    %cst_33 = arith.constant 1.400000e+01 : f32
    %122 = vector.broadcast %cst_33 : f32 to vector<1x32xf32>
    %123 = arith.divf %121, %122 : vector<1x32xf32>
    %124 = arith.mulf %118, %118 : vector<1x32xf32>
    %125 = arith.subf %123, %124 : vector<1x32xf32>
    %126 = vector.broadcast %118 : vector<1x32xf32> to vector<14x32xf32>
    %127 = arith.subf %112, %126 : vector<14x32xf32>
    %cst_34 = arith.constant 9.99999974E-6 : f32
    %128 = vector.broadcast %cst_34 : f32 to vector<1x32xf32>
    %129 = arith.addf %125, %128 : vector<1x32xf32>
    %130 = math.rsqrt %129 : vector<1x32xf32>
    %131 = vector.broadcast %130 : vector<1x32xf32> to vector<14x32xf32>
    %132 = arith.mulf %127, %131 : vector<14x32xf32>
    %133 = vector.broadcast %113 : vector<1x32xf32> to vector<14x32xf32>
    %134 = arith.mulf %132, %133 : vector<14x32xf32>
    %135 = vector.broadcast %114 : vector<1x32xf32> to vector<14x32xf32>
    %136 = arith.addf %134, %135 : vector<14x32xf32>
    %137 = arith.addf %39, %136 : vector<14x32xf32>
    %138 = arith.truncf %137 : vector<14x32xf32> to vector<14x32xbf16>
    %c32_35 = arith.constant 32 : index
    %c32_36 = arith.constant 32 : index
    %139 = vector.load %arg2[%c32_35, %c32_36] : memref<128x128xbf16, #tpu.memory_space<vmem>>, vector<32x64xbf16>
    %cst_37 = arith.constant dense<0.000000e+00> : vector<14x64xf32>
    %140 = tpu.matmul %138, %139, %cst_37 {dimension_numbers = #tpu.dot_dimension_numbers<[1], [0], [0], [1], [0, 0, 1, 1], [], []>} : vector<14x32xbf16>, vector<32x64xbf16>, vector<14x64xf32> -> vector<14x64xf32>
    %141 = vector.extract_strided_slice %2 {offsets = [1, 32], sizes = [1, 64], strides = [1, 1]} : vector<8x128xf32> to vector<1x64xf32>
    %142 = vector.broadcast %141 : vector<1x64xf32> to vector<14x64xf32>
    %143 = arith.addf %140, %142 : vector<14x64xf32>
    %cst_38 = arith.constant 0.000000e+00 : f32
    %144 = vector.broadcast %cst_38 : f32 to vector<14x64xf32>
    %145 = arith.maximumf %143, %144 : vector<14x64xf32>
    %146 = arith.truncf %145 : vector<14x64xf32> to vector<14x64xbf16>
    %c64 = arith.constant 64 : index
    %c0_39 = arith.constant 0 : index
    %147 = vector.load %arg2[%c64, %c0_39] : memref<128x128xbf16, #tpu.memory_space<vmem>>, vector<64x32xbf16>
    %cst_40 = arith.constant dense<0.000000e+00> : vector<14x32xf32>
    %148 = tpu.matmul %146, %147, %cst_40 {dimension_numbers = #tpu.dot_dimension_numbers<[1], [0], [0], [1], [0, 0, 1, 1], [], []>} : vector<14x64xbf16>, vector<64x32xbf16>, vector<14x32xf32> -> vector<14x32xf32>
    %149 = vector.extract_strided_slice %2 {offsets = [1, 96], sizes = [1, 32], strides = [1, 1]} : vector<8x128xf32> to vector<1x32xf32>
    %150 = vector.broadcast %149 : vector<1x32xf32> to vector<14x32xf32>
    %151 = arith.addf %148, %150 : vector<14x32xf32>
    %152 = arith.addf %137, %151 : vector<14x32xf32>
    %153 = vector.extract_strided_slice %2 {offsets = [3, 0], sizes = [1, 32], strides = [1, 1]} : vector<8x128xf32> to vector<1x32xf32>
    %154 = vector.extract_strided_slice %2 {offsets = [3, 32], sizes = [1, 32], strides = [1, 1]} : vector<8x128xf32> to vector<1x32xf32>
    %cst_41 = arith.constant dense<0.000000e+00> : vector<32xf32>
    %155 = vector.multi_reduction <add>, %152, %cst_41 [0] : vector<14x32xf32> to vector<32xf32>
    %156 = vector.shape_cast %155 : vector<32xf32> to vector<1x32xf32>
    %cst_42 = arith.constant 1.400000e+01 : f32
    %157 = vector.broadcast %cst_42 : f32 to vector<1x32xf32>
    %158 = arith.divf %156, %157 : vector<1x32xf32>
    %159 = arith.mulf %152, %152 : vector<14x32xf32>
    %cst_43 = arith.constant dense<0.000000e+00> : vector<32xf32>
    %160 = vector.multi_reduction <add>, %159, %cst_43 [0] : vector<14x32xf32> to vector<32xf32>
    %161 = vector.shape_cast %160 : vector<32xf32> to vector<1x32xf32>
    %cst_44 = arith.constant 1.400000e+01 : f32
    %162 = vector.broadcast %cst_44 : f32 to vector<1x32xf32>
    %163 = arith.divf %161, %162 : vector<1x32xf32>
    %164 = arith.mulf %158, %158 : vector<1x32xf32>
    %165 = arith.subf %163, %164 : vector<1x32xf32>
    %166 = vector.broadcast %158 : vector<1x32xf32> to vector<14x32xf32>
    %167 = arith.subf %152, %166 : vector<14x32xf32>
    %cst_45 = arith.constant 9.99999974E-6 : f32
    %168 = vector.broadcast %cst_45 : f32 to vector<1x32xf32>
    %169 = arith.addf %165, %168 : vector<1x32xf32>
    %170 = math.rsqrt %169 : vector<1x32xf32>
    %171 = vector.broadcast %170 : vector<1x32xf32> to vector<14x32xf32>
    %172 = arith.mulf %167, %171 : vector<14x32xf32>
    %173 = vector.broadcast %153 : vector<1x32xf32> to vector<14x32xf32>
    %174 = arith.mulf %172, %173 : vector<14x32xf32>
    %175 = vector.broadcast %154 : vector<1x32xf32> to vector<14x32xf32>
    %176 = arith.addf %174, %175 : vector<14x32xf32>
    %c0_46 = arith.constant 0 : index
    %c0_47 = arith.constant 0 : index
    %177 = vector.load %arg4[%c0_46, %c0_47] : memref<14x32xf32, #tpu.memory_space<vmem>>, vector<14x32xf32>
    tpu.vector_store %arg4[%c0_46, %c0_47], %176 {strides = array<i32>} : memref<14x32xf32, #tpu.memory_space<vmem>>, vector<14x32xf32>,
    return
  }
}

</mosaic_0001>

<bundles_post_ra>
// kernel: multilayer_forward.1
= control target key start
LH: loop header
LB: loop body
LE: loop exit
PB: predicated region body
PF: predicated region fallthrough
CT: control target
= control target key end

     0   :  { %s1185_s0 = inlined_call_operand.vmem [shape: f32[14,33], index: 0, kind: input, shape index: {}]   ;;  %s1186_s1 = inlined_call_operand.vmem [shape: bf16[14,14], index: 1, kind: input, shape index: {}]   ;;  %s1187_s2 = inlined_call_operand.vmem [shape: bf16[128,128], index: 2, kind: input, shape index: {}]   ;;  %s1188_s3 = inlined_call_operand.vmem [shape: f32[8,128], index: 3, kind: input, shape index: {}]   ;;  %s1189_s4 = inlined_call_operand.hbm [shape: f32[14,32], index: 4, kind: output, shape index: {}]  }
   0x1   :  { %v813_v0 = vld [vmem:[%s1187_s2 + $0x8] sm:$0xff] }
   0x2   :  { %9 = vsyncpa [#allocation3], 0  ;;  %49 = vmatpush.bf16.msra.mxu0 %v813_v0  ;;  %v812_v1 = vld [vmem:[%s1187_s2] sm:$0xff]  ;;  %v977_v3 = vld [vmem:[%s1185_s0 + $0x8] sm:$0x3f]  ;;  %vm39_vm0 = vcmask 261120  }
   0x3   :  { %v972_v2 = vld [vmem:[%s1185_s0] sm:$0xff]  ;;  %vm70_vm1 = vcmask 1046528   ;;  %vm66_vm2 = vcmask 113664   ;;  %s923_s28 = smov 80   ;;  %s924_s29 = smov 40   ;;  %v929_v28 = vmov 32  }
   0x4   :  { %v22_v4 = vpack.c.bf16 %v977_v3, %v972_v2  ;;  %v985_v5 = vld [vmem:[%s1188_s3] sm:$0xff]  ;;  %s922_s3 = smov 56   ;;  %s925_s30 = smov 88   ;;  %839 = vset.pattern.permute.xlu0 %v929_v28  ;;  %838 = vset.pattern.permute.xlu2 %v929_v28  ;;  %vm183_vm3 = vcmask 64512   ;;  %v930_v45 = vmov -1e+09  }
   0x5   :  { %v988_v6 = vperm.slane %v985_v5, 0  ;;  %v774_v10 = vld [vmem:[%s1186_s1] sm:$0xf]  ;;  %v814_v11 = vld [vmem:[%s1186_s1] sm:$0x70]  ;;  %s921_s1 = smov 48  }
   0x6   :  { %50 = vmatpush.bf16.msra.mxu0 %v812_v1  ;;  %v775_v16 = vor.u32 %v814_v11, %v774_v10  ;;  %s926_s5 = smov 72   ;;  %s927_s6 = smov 96   ;;  %v156_v42 = vperm.slane %v985_v5, 4  ;;  %vm287_vm6 = vcmask 111616   ;;  %vm515_vm7 = vcmask 130048  }
   0x7   :  { %s928_s7 = smov 64   ;;  %s931_s8 = smov 16   ;;  %vm518_vm8 = vcmask 195584   ;;  %vm91_vm9 = vcmask 259072  }
   0x8   :  { %s932_s9 = smov 24   ;;  %s933_s10 = smov 8  }
   0x9   :  { %771 = vmatmul.msk.bf16.vlgmr.msra.gmra.mxu0 %vm39_vm0, %v22_v4  ;;  %s934_s11 = smov 32   ;;  %s751_s26 = sshll.u32 %s1189_s4, 4  ;;  %s752_s26 = int_to_ptr.hbm [resolvable:$true] %s751_s26 }
   0xa   :  { %s937_s27 = smov 128  }
  0x86   :  { %v52_v7 = vpop.f32.mrf.mxu0 }
  0x87   :  { %v161_v8 = vadd.f32 %v988_v6, %v52_v7 }
  0x89   :  { %v163_v9 = vmul.f32 0.35355338, %v161_v8  ;;  %v167_v13 = vpack.c.bf16 %v161_v8, %v161_v8 }
  0x8b   :  { %v165_v17 = vpack.c.bf16 %v163_v9, %v163_v9  ;;  %v178_v21 = vunpack.c.l.b16 %v167_v13 }
  0x8d   :  { %v171_v24 = vunpack.c.l.b16 %v165_v17 }
  0x8e   :  { %v54_v12 = vpop.f32.mrf.mxu0 }
  0x8f   :  { %v162_v14 = vadd.f32 %v988_v6, %v54_v12  ;;  %v59_v15 = vpack.c.bf16 %v54_v12, %v52_v7 }
  0x91   :  { %v164_v18 = vmul.f32 0.35355338, %v162_v14  ;;  %v168_v19 = vpack.c.bf16 %v162_v14, %v162_v14  ;;  %v72_v20 = vsel %vm70_vm1, %v59_v15, 0 }
  0x92   :  { %81 = vmatpush.bf16.msra.mxu1 %v72_v20 }
  0x93   :  { %v166_v22 = vpack.c.bf16 %v164_v18, %v164_v18  ;;  %v179_v23 = vunpack.c.l.b16 %v168_v19 }
  0x95   :  { %v172_v25 = vunpack.c.l.b16 %v166_v22  ;;  %v999_v26 = vpack.c.b16 %v179_v23, %v178_v21  ;;  %776 = vmatmul.msk.bf16.vlgmr.msra.gmra.mxu1 %vm66_vm2, %v775_v16 }
  0x97   :  { %v173_v27 = vpack.c.b16 %v172_v25, %v171_v24  ;;  %230 = vrot.lane.b32.xlu1 %v999_v26, %s921_s1  ;;  %206 = vrot.lane.b32.xlu0 %v999_v26, %s922_s3 }
  0x99   :  { %228 = vrot.lane.b32.xlu2 %v173_v27, %s923_s28 }
  0x9f   :  { %254 = vrot.lane.b32.xlu1 %v999_v26, %s924_s29  ;;  %204 = vrot.lane.b32.xlu0 %v173_v27, %s925_s30 }
  0xa1   :  { %252 = vrot.lane.b32.xlu2 %v173_v27, %s926_s5 }
  0xa7   :  { %174 = vrot.lane.b32.xlu1 %v173_v27, %s927_s6  ;;  %181 = vrot.lane.b32.xlu0 %v999_v26, %s928_s7 }
  0xa9   :  { %148 = vperm.xlu2 %838, %v972_v2  }
  0xaf   :  { %153 = vperm.xlu0 %839, %v977_v3  }
  0xf3   :  { %v229_v33 = vpop.permute.xlu2 %228 }
  0xfb   :  { %v253_v37 = vpop.permute.xlu2 %252 }
 0x103   :  { %v149_v44 = vpop.permute.xlu2 %148 }
 0x104   :  { %vm157_vm4 = vcmp.eq.f32.partialorder %v149_v44, %v156_v42 }
 0x105   :  { %v159_v46 = vsel %vm157_vm4, 0.0, %v930_v45 }
 0x109   :  { %v231_v29 = vpop.permute.xlu1 %230  ;;  %v207_v30 = vpop.permute.xlu0 %206 }
 0x10a   :  { %v212_v31 = vsel %vm183_vm3, %v207_v30, 0  ;;  %v236_v32 = vsel %vm183_vm3, %v231_v29, 0 }
 0x10b   :  { %221 = vmatpush.bf16.xpose.msra.mxu3 %v212_v31  ;;  %245 = vmatpush.bf16.xpose.msrb.mxu1 %v236_v32 }
 0x111   :  { %v255_v34 = vpop.permute.xlu1 %254  ;;  %v205_v35 = vpop.permute.xlu0 %204 }
 0x112   :  { %778 = vmatmul.msk.bf16.vlgmr.msra.gmra.mxu3 %vm183_vm3, %v205_v35  ;;  %779 = vmatmul.msk.bf16.vlgmr.msrb.gmra.mxu1 %vm183_vm3, %v229_v33  ;;  %v260_v36 = vsel %vm183_vm3, %v255_v34, 0  ;;  %v1018_v41 = vpop.f32.mrf.mxu1 }
 0x113   :  { %269 = vmatpush.bf16.xpose.msrb.mxu0 %v260_v36 }
 0x119   :  { %v182_v38 = vpop.permute.xlu0 %181  ;;  %v175_v40 = vpop.permute.xlu1 %174 }
 0x11a   :  { %780 = vmatmul.msk.bf16.vlgmr.msrb.gmra.mxu0 %vm183_vm3, %v253_v37  ;;  %v188_v39 = vsel %vm183_vm3, %v182_v38, 0  ;;  %v1021_v43 = vpop.f32.mrf.mxu1 }
 0x11b   :  { %197 = vmatpush.bf16.xpose.msra.mxu2 %v188_v39 }
 0x121   :  { %v154_v48 = vpop.permute.xlu0 %153 }
 0x122   :  { %777 = vmatmul.msk.bf16.vlgmr.msra.gmra.mxu2 %vm183_vm3, %v175_v40  ;;  %vm158_vm5 = vcmp.eq.f32.partialorder %v154_v48, %v156_v42 }
 0x123   :  { %v160_v52 = vsel %vm158_vm5, 0.0, %v930_v45 }
 0x18f   :  { %v247_v47 = vpop.f32.mrf.mxu1 }
 0x190   :  { %v280_v49 = vadd.f32 %v247_v47, %v159_v46 }
 0x192   :  { %v297_v50 = vsel %vm66_vm2, %v280_v49, -inf }
 0x193   :  { %298 = vmax.xlane.f32.xlu0 %v297_v50 }
 0x195   :  { %v223_v51 = vpop.f32.mrf.mxu3 }
 0x196   :  { %v278_v60 = vadd.f32 %v223_v51, %v159_v46 }
 0x197   :  { %v249_v53 = vpop.f32.mrf.mxu1  ;;  %v271_v54 = vpop.f32.mrf.mxu0 }
 0x198   :  { %v281_v55 = vadd.f32 %v249_v53, %v160_v52  ;;  %v282_v56 = vadd.f32 %v271_v54, %v159_v46  ;;  %v291_v62 = vsel %vm66_vm2, %v278_v60, -inf }
 0x19a   :  { %v303_v57 = vsel %vm66_vm2, %v282_v56, -inf  ;;  %v300_v58 = vsel %vm287_vm6, %v281_v55, -inf }
 0x19b   :  { %304 = vmax.xlane.f32.xlu1 %v303_v57  ;;  %301 = vmax.xlane.f32.xlu2 %v300_v58 }
 0x19d   :  { %v225_v59 = vpop.f32.mrf.mxu3 }
 0x19e   :  { %v279_v61 = vadd.f32 %v225_v59, %v160_v52 }
 0x19f   :  { %v273_v0 = vpop.f32.mrf.mxu0 }
 0x1a0   :  { %v294_v63 = vsel %vm287_vm6, %v279_v61, -inf  ;;  %v283_v4 = vadd.f32 %v273_v0, %v160_v52 }
 0x1a2   :  { %v306_v9 = vsel %vm287_vm6, %v283_v4, -inf }
 0x1a3   :  { %292 = vmax.xlane.f32.xlu1 %v291_v62  ;;  %295 = vmax.xlane.f32.xlu2 %v294_v63 }
 0x1a5   :  { %v199_v1 = vpop.f32.mrf.mxu2 }
 0x1a6   :  { %v1028_v7 = vadd.f32 %v199_v1, %v159_v46 }
 0x1a8   :  { %v284_v8 = vsel %vm66_vm2, %v1028_v7, -inf }
 0x1ab   :  { %285 = vmax.xlane.f32.xlu1 %v284_v8  ;;  %307 = vmax.xlane.f32.xlu2 %v306_v9 }
 0x1ad   :  { %v201_v10 = vpop.f32.mrf.mxu2 }
 0x1ae   :  { %v277_v11 = vadd.f32 %v201_v10, %v160_v52 }
 0x1b0   :  { %v288_v12 = vsel %vm287_vm6, %v277_v11, -inf }
 0x1b3   :  { %289 = vmax.xlane.f32.xlu2 %v288_v12 }
 0x206   :  { %v299_v13 = vpop.xlane.xlu0 %298 }
 0x207   :  { %v313_v14 = vsub.f32 %v280_v49, %v299_v13 }
 0x209   :  { %v325_v15 = vmul.f32 1.442695, %v313_v14 }
 0x20b   :  { %855 = vpow2.f32 %v325_v15 }
 0x20e   :  { %v305_v16 = vpop.xlane.xlu1 %304  ;;  %v302_v17 = vpop.xlane.xlu2 %301 }
 0x20f   :  { %v315_v18 = vsub.f32 %v282_v56, %v305_v16  ;;  %v314_v28 = vsub.f32 %v281_v55, %v302_v17  ;;  %v1067_v55 = vperm.slane %v985_v5, 2 }
 0x211   :  { %v1034_v19 = vpop.eup %855  ;;  %v329_v20 = vmul.f32 1.442695, %v315_v18  ;;  %v327_v32 = vmul.f32 1.442695, %v314_v28 }
 0x212   :  { %v345_v21 = vsel %vm66_vm2, %v1034_v19, 0.0 }
 0x213   :  { %857 = vpow2.f32 %v329_v20  ;;  %346 = vadd.xlane.f32.xlu2 %v345_v21 }
 0x216   :  { %v293_v22 = vpop.xlane.xlu1 %292  ;;  %v296_v23 = vpop.xlane.xlu2 %295 }
 0x217   :  { %v311_v24 = vsub.f32 %v278_v60, %v293_v22  ;;  %v312_v25 = vsub.f32 %v279_v61, %v296_v23 }
 0x219   :  { %v1038_v27 = vpop.eup %857  ;;  %v321_v29 = vmul.f32 1.442695, %v311_v24  ;;  %v323_v30 = vmul.f32 1.442695, %v312_v25 }
 0x21a   :  { %v351_v31 = vsel %vm66_vm2, %v1038_v27, 0.0 }
 0x21b   :  { %859 = vpow2.f32 %v321_v29  ;;  %352 = vadd.xlane.f32.xlu1 %v351_v31 }
 0x21c   :  { %861 = vpow2.f32 %v323_v30 }
 0x21d   :  { %863 = vpow2.f32 %v327_v32 }
 0x21e   :  { %v308_v33 = vpop.xlane.xlu2 %307  ;;  %v286_v47 = vpop.xlane.xlu1 %285 }
 0x21f   :  { %v316_v34 = vsub.f32 %v283_v4, %v308_v33  ;;  %v309_v49 = vsub.f32 %v1028_v7, %v286_v47 }
 0x221   :  { %v1042_v35 = vpop.eup %859  ;;  %v331_v36 = vmul.f32 1.442695, %v316_v34  ;;  %v317_v51 = vmul.f32 1.442695, %v309_v49 }
 0x222   :  { %v862_v37 = vpop.eup %861  ;;  %v339_v38 = vsel %vm66_vm2, %v1042_v35, 0.0 }
 0x223   :  { %340 = vadd.xlane.f32.xlu0 %v339_v38  ;;  %v342_v39 = vsel %vm287_vm6, %v862_v37, 0.0  ;;  %865 = vpow2.f32 %v331_v36  ;;  %v864_v40 = vpop.eup %863 }
 0x224   :  { %343 = vadd.xlane.f32.xlu1 %v342_v39  ;;  %v348_v44 = vsel %vm287_vm6, %v864_v40, 0.0 }
 0x226   :  { %v290_v46 = vpop.xlane.xlu2 %289 }
 0x227   :  { %v310_v48 = vsub.f32 %v277_v11, %v290_v46 }
 0x229   :  { %v866_v42 = vpop.eup %865  ;;  %v319_v50 = vmul.f32 1.442695, %v310_v48 }
 0x22a   :  { %v354_v45 = vsel %vm287_vm6, %v866_v42, 0.0 }
 0x22b   :  { %349 = vadd.xlane.f32.xlu0 %v348_v44  ;;  %355 = vadd.xlane.f32.xlu2 %v354_v45  ;;  %867 = vpow2.f32 %v319_v50 }
 0x22c   :  { %869 = vpow2.f32 %v317_v51 }
 0x231   :  { %v1058_v52 = vpop.eup %867 }
 0x232   :  { %v1060_v53 = vpop.eup %869  ;;  %v336_v54 = vsel %vm287_vm6, %v1058_v52, 0.0 }
 0x23d   :  { %440 = vrot.lane.b32.xlu1 %v999_v26, %s931_s8 }
 0x23f   :  { %413 = vrot.lane.b32.xlu0 %v999_v26, %s932_s9 }
 0x243   :  { %467 = vrot.lane.b32.xlu2 %v999_v26, %s933_s10 }
 0x24b   :  { %386 = vrot.lane.b32.xlu2 %v999_v26, %s934_s11  ;;  %v333_v26 = vsel %vm66_vm2, %v1060_v53, 0.0 }
 0x267   :  { %337 = vadd.xlane.f32.xlu1 %v336_v54 }
 0x269   :  { %334 = vadd.xlane.f32.xlu0 %v333_v26 }
 0x27d   :  { %597 = vrot.lane.b32.xlu0 %v1067_v55, %s928_s7 }
 0x280   :  { %141 = vrot.lane.b32.xlu1 %v1067_v55, %s927_s6 }
 0x286   :  { %v347_v58 = vpop.xlane.xlu2 %346 }
 0x28e   :  { %v353_v56 = vpop.xlane.xlu1 %352 }
 0x28f   :  { %871 = vrcp.f32 %v353_v56 }
 0x290   :  { %873 = vrcp.f32 %v347_v58 }
 0x295   :  { %v872_v62 = vpop.eup %871 }
 0x296   :  { %v341_v57 = vpop.xlane.xlu0 %340  ;;  %v874_v63 = vpop.eup %873  ;;  %v371_v1 = vmul.f32 %v872_v62, %v1038_v27  ;;  %v1099_v62 = vperm.slane %v985_v5, 1 }
 0x297   :  { %v344_v59 = vpop.xlane.xlu1 %343  ;;  %875 = vrcp.f32 %v341_v57  ;;  %v369_v10 = vmul.f32 %v874_v63, %v1034_v19 }
 0x298   :  { %877 = vrcp.f32 %v344_v59  ;;  %v379_v11 = vpack.c.bf16 %v371_v1, %v371_v1  ;;  %617 = vrot.lane.b32.xlu0 %v1099_v62, %s927_s6 }
 0x299   :  { %v377_v20 = vpack.c.bf16 %v369_v10, %v369_v10 }
 0x29a   :  { %v464_v21 = vunpack.c.l.b16 %v379_v11 }
 0x29b   :  { %v437_v28 = vunpack.c.l.b16 %v377_v20 }
 0x29d   :  { %v876_v0 = vpop.eup %875 }
 0x29e   :  { %v350_v60 = vpop.xlane.xlu0 %349  ;;  %v356_v61 = vpop.xlane.xlu2 %355  ;;  %v367_v14 = vmul.f32 %v876_v0, %v1042_v35 }
 0x29f   :  { %879 = vrcp.f32 %v350_v60  ;;  %v878_v4 = vpop.eup %877 }
 0x2a0   :  { %881 = vrcp.f32 %v356_v61  ;;  %v368_v15 = vmul.f32 %v878_v4, %v862_v37  ;;  %v375_v23 = vpack.c.bf16 %v367_v14, %v367_v14  ;;  %v815_v61 = vld [vmem:[%s1187_s2 + $0x10] sm:$0xff] }
 0x2a2   :  { %v376_v24 = vpack.c.bf16 %v368_v15, %v368_v15  ;;  %v410_v30 = vunpack.c.l.b16 %v375_v23  ;;  %v86_v23 = vadd.f32 %v1021_v43, %v988_v6  ;;  %v935_v43 = vmov 14.0  }
 0x2a4   :  { %v411_v31 = vunpack.c.l.b16 %v376_v24 }
 0x2a5   :  { %v880_v7 = vpop.eup %879 }
 0x2a6   :  { %v882_v8 = vpop.eup %881  ;;  %v370_v9 = vmul.f32 %v880_v7, %v864_v40  ;;  %v468_v13 = vpop.permute.xlu2 %467  ;;  %v412_v37 = vpack.c.b16 %v411_v31, %v410_v30 }
 0x2a7   :  { %v372_v12 = vmul.f32 %v882_v8, %v866_v42  ;;  %v473_v16 = vsel %vm70_vm1, %v468_v13, 0 }
 0x2a8   :  { %482 = vmatpush.bf16.msra.mxu0 %v473_v16  ;;  %v378_v18 = vpack.c.bf16 %v370_v9, %v370_v9 }
 0x2a9   :  { %v380_v17 = vpack.c.bf16 %v372_v12, %v372_v12 }
 0x2aa   :  { %v438_v27 = vunpack.c.l.b16 %v378_v18 }
 0x2ab   :  { %v465_v22 = vunpack.c.l.b16 %v380_v17 }
 0x2ac   :  { %v439_v35 = vpack.c.b16 %v438_v27, %v437_v28 }
 0x2ad   :  { %v466_v25 = vpack.c.b16 %v465_v22, %v464_v21  ;;  %v84_v22 = vadd.f32 %v1018_v41, %v988_v6 }
 0x2ae   :  { %v387_v29 = vpop.permute.xlu2 %386 }
 0x2af   :  { %v441_v19 = vpop.permute.xlu1 %440  ;;  %784 = vmatmul.msk.bf16.vlgmr.msra.gmra.mxu0 %vm66_vm2, %v466_v25  ;;  %v392_v33 = vsel %vm70_vm1, %v387_v29, 0  ;;  %v1114_v24 = vadd.f32 %v84_v22, %v972_v2  ;;  %v1117_v25 = vadd.f32 %v86_v23, %v977_v3 }
 0x2b0   :  { %v446_v32 = vsel %vm70_vm1, %v441_v19, 0  ;;  %401 = vmatpush.bf16.msrb.mxu2 %v392_v33 }
 0x2b1   :  { %455 = vmatpush.bf16.msra.mxu1 %v446_v32  ;;  %v414_v34 = vpop.permute.xlu0 %413  ;;  %v90_v27 = vsel %vm39_vm0, %v1114_v24, 0.0  ;;  %v108_v28 = vmul.f32 %v1114_v24, %v1114_v24  ;;  %v92_v19 = vsel %vm91_vm9, %v1117_v25, 0.0  ;;  %v109_v41 = vmul.f32 %v1117_v25, %v1117_v25 }
 0x2b2   :  { %v419_v36 = vsel %vm70_vm1, %v414_v34, 0  ;;  %v93_v6 = vadd.f32 %v92_v19, %v90_v27 }
 0x2b3   :  { %428 = vmatpush.bf16.msrb.mxu3 %v419_v36  ;;  %v110_v29 = vsel %vm39_vm0, %v108_v28, 0.0  ;;  %v111_v30 = vsel %vm91_vm9, %v109_v41, 0.0 }
 0x2b4   :  { %783 = vmatmul.msk.bf16.vlgmr.msra.gmra.mxu1 %vm66_vm2, %v439_v35  ;;  %v94_v31 = vrot.slane %v93_v6, 4  ;;  %v112_v32 = vadd.f32 %v111_v30, %v110_v29 }
 0x2b6   :  { %782 = vmatmul.msk.bf16.vlgmr.msrb.gmra.mxu3 %vm66_vm2, %v412_v37  ;;  %v95_v34 = vadd.f32 %v94_v31, %v93_v6  ;;  %v113_v35 = vrot.slane %v112_v32, 4 }
 0x2b8   :  { %v96_v37 = vrot.slane %v95_v34, 2 }
 0x2da   :  { %v338_v38 = vpop.xlane.xlu1 %337 }
 0x2db   :  { %883 = vrcp.f32 %v338_v38  ;;  %v114_v38 = vadd.f32 %v113_v35, %v112_v32 }
 0x2dc   :  { %v335_v39 = vpop.xlane.xlu0 %334 }
 0x2dd   :  { %885 = vrcp.f32 %v335_v39 }
 0x2de   :  { %887 = vrcp.f32 %v935_v43 }
 0x2e1   :  { %v884_v40 = vpop.eup %883 }
 0x2e2   :  { %v366_v42 = vmul.f32 %v884_v40, %v1058_v52  ;;  %v97_v40 = vadd.f32 %v96_v37, %v95_v34 }
 0x2e3   :  { %v886_v44 = vpop.eup %885 }
 0x2e4   :  { %v374_v45 = vpack.c.bf16 %v366_v42, %v366_v42  ;;  %v365_v46 = vmul.f32 %v886_v44, %v1060_v53  ;;  %v816_v53 = vld [vmem:[%s1187_s2 + $0x18] sm:$0xff]  ;;  %v888_v33 = vpop.eup %887  ;;  %v115_v42 = vrot.slane %v114_v38, 2 }
 0x2e5   :  { %548 = vmatpush.bf16.msra.mxu2 %v816_v53  ;;  %v101_v36 = vmul.f32 14.0, %v888_v33  ;;  %vm105_vm10 = vweird.f32 %v888_v33 }
 0x2e6   :  { %v373_v47 = vpack.c.bf16 %v365_v46, %v365_v46  ;;  %v384_v48 = vunpack.c.l.b16 %v374_v45  ;;  %v98_v45 = vrot.slane %v97_v40, 1  ;;  %v116_v46 = vadd.f32 %v115_v42, %v114_v38 }
 0x2e7   :  { %v102_v39 = vsub.f32 1.0, %v101_v36 }
 0x2e8   :  { %v383_v49 = vunpack.c.l.b16 %v373_v47 }
 0x2e9   :  { %549 = vmatpush.bf16.msra.mxu2 %v815_v61  ;;  %v103_v44 = vmul.f32 %v888_v33, %v102_v39 }
 0x2ea   :  { %v385_v50 = vpack.c.b16 %v384_v48, %v383_v49  ;;  %v117_v49 = vrot.slane %v116_v46, 1 }
 0x2eb   :  { %v104_v48 = vadd.f32 %v888_v33, %v103_v44 }
 0x2ec   :  { %781 = vmatmul.msk.bf16.vlgmr.msrb.gmra.mxu2 %vm66_vm2, %v385_v50  ;;  %v99_v50 = vadd.f32 %v98_v45, %v97_v40  ;;  %vm675_vm2 = vcmask 523264  }
 0x32c   :  { %v484_v57 = vpop.f32.mrf.mxu0 }
 0x331   :  { %v457_v51 = vpop.f32.mrf.mxu1 }
 0x334   :  { %v486_v52 = vpop.f32.mrf.mxu0 }
 0x335   :  { %v850_v60 = vpack.i.bf16 %v486_v52, %v484_v57 }
 0x339   :  { %v459_v54 = vpop.f32.mrf.mxu1  ;;  %v430_v26 = vpop.f32.mrf.mxu3 }
 0x33a   :  { %v840_v56 = vpack.i.bf16 %v459_v54, %v457_v51  ;;  %v1129_v54 = vsel %vm105_vm10, %v888_v33, %v104_v48 }
 0x33b   :  { %v107_v57 = vmul.f32 %v1129_v54, %v99_v50  ;;  %v598_v50 = vpop.permute.xlu0 %597 }
 0x33c   :  { %841 = vrot.lane.b32.xlu2 %v840_v56, %s931_s8  ;;  %v118_v56 = vadd.f32 %v117_v49, %v116_v46 }
 0x33d   :  { %v120_v52 = vmul.f32 %v107_v57, %v107_v57  ;;  %v122_v39 = vsub.f32 %v1114_v24, %v107_v57  ;;  %v123_v40 = vsub.f32 %v1117_v25, %v107_v57 }
 0x341   :  { %v432_v58 = vpop.f32.mrf.mxu3 }
 0x342   :  { %v845_v59 = vpack.i.bf16 %v432_v58, %v430_v26 }
 0x344   :  { %846 = vrot.lane.b32.xlu2 %v845_v59, %s933_s10  ;;  %v119_v59 = vmul.f32 %v118_v56, %v1129_v54 }
 0x34c   :  { %851 = vrot.lane.b32.xlu2 %v850_v60, %s932_s9 }
 0x354   :  { %612 = vrot.lane.b32.xlu2 %v816_v53, %s927_s6 }
 0x35c   :  { %602 = vrot.lane.b32.xlu2 %v1067_v55, %s934_s11 }
 0x364   :  { %610 = vrot.lane.b32.xlu2 %v815_v61, %s927_s6 }
 0x36c   :  { %672 = vrot.lane.b32.xlu2 %v1099_v62, %s934_s11 }
 0x36f   :  { %v403_v0 = vpop.f32.mrf.mxu2 }
 0x377   :  { %v405_v8 = vpop.f32.mrf.mxu2 }
 0x396   :  { %v842_v63 = vpop.permute.xlu2 %841 }
 0x397   :  { %v844_v11 = vunpack.i.h.bf16 %v842_v63  ;;  %v843_v12 = vunpack.i.l.bf16 %v842_v63 }
 0x39e   :  { %v847_v1 = vpop.permute.xlu2 %846 }
 0x39f   :  { %v849_v4 = vunpack.i.h.bf16 %v847_v1  ;;  %v848_v7 = vunpack.i.l.bf16 %v847_v1 }
 0x3a1   :  { %v514_v9 = vsel %vm183_vm3, %v405_v8, %v849_v4  ;;  %v513_v10 = vsel %vm183_vm3, %v403_v0, %v848_v7  ;;  %v121_v0 = vsub.f32 %v119_v59, %v120_v52  ;;  %v142_v59 = vpop.permute.xlu1 %141 }
 0x3a2   :  { %v516_v16 = vsel %vm515_vm7, %v513_v10, %v843_v12  ;;  %v517_v17 = vsel %vm515_vm7, %v514_v9, %v844_v11 }
 0x3a3   :  { %v124_v10 = vadd.f32 1e-05, %v121_v0 }
 0x3a5   :  { %889 = vrsqrt.f32 %v124_v10  ;;  %vm131_vm11 = vweird.f32 %v124_v10 }
 0x3a6   :  { %v852_v13 = vpop.permute.xlu2 %851 }
 0x3a7   :  { %v854_v14 = vunpack.i.h.bf16 %v852_v13  ;;  %v853_v15 = vunpack.i.l.bf16 %v852_v13 }
 0x3a9   :  { %v519_v18 = vsel %vm518_vm8, %v516_v16, %v853_v15  ;;  %v520_v20 = vsel %vm518_vm8, %v517_v17, %v854_v14 }
 0x3aa   :  { %v521_v21 = vpack.c.bf16 %v520_v20, %v519_v18 }
 0x3ac   :  { %793 = vmatmul.msk.bf16.vlgmr.msra.gmra.mxu2 %vm39_vm0, %v521_v21  ;;  %v890_v21 = vpop.eup %889 }
 0x3ad   :  { %v126_v19 = vmul.f32 %v890_v21, %v124_v10  ;;  %vm132_vm12 = vweird.f32 %v890_v21  ;;  %v618_v10 = vpop.permute.xlu0 %617 }
 0x3ae   :  { %v613_v47 = vpop.permute.xlu2 %612  ;;  %vm133_vm13 = vmor %vm131_vm11, %vm132_vm12 }
 0x3af   :  { %629 = vmatpush.bf16.msra.mxu3 %v613_v47  ;;  %v127_v30 = vmul.f32 %v890_v21, %v126_v19 }
 0x3b1   :  { %v128_v32 = vmul.f32 0.5, %v127_v30 }
 0x3b3   :  { %v129_v33 = vsub.f32 1.5, %v128_v32 }
 0x3b5   :  { %v130_v36 = vmul.f32 %v890_v21, %v129_v33 }
 0x3b6   :  { %v603_v14 = vpop.permute.xlu2 %602 }
 0x3b7   :  { %v134_v42 = vsel %vm133_vm13, %v890_v21, %v130_v36 }
 0x3b8   :  { %v135_v46 = vmul.f32 %v134_v42, %v122_v39  ;;  %v136_v47 = vmul.f32 %v134_v42, %v123_v40 }
 0x3ba   :  { %v138_v24 = vmul.f32 %v1067_v55, %v135_v46  ;;  %v139_v25 = vmul.f32 %v1067_v55, %v136_v47  ;;  %v819_v55 = vld [vmem:[%s1187_s2 + $0x30] sm:$0xff] }
 0x3be   :  { %v611_v41 = vpop.permute.xlu2 %610 }
 0x3bf   :  { %630 = vmatpush.bf16.msra.mxu3 %v611_v41 }
 0x42f   :  { %v551_v51 = vpop.f32.mrf.mxu2 }
 0x430   :  { %v552_v26 = vadd.f32 %v551_v51, %v1099_v62 }
 0x432   :  { %v1134_v58 = vadd.f32 %v552_v26, %v972_v2 }
 0x434   :  { %v568_v61 = vmul.f32 %v1134_v58, %v1134_v58  ;;  %v558_v1 = vsel %vm39_vm0, %v1134_v58, 0.0 }
 0x436   :  { %v570_v8 = vsel %vm39_vm0, %v568_v61, 0.0 }
 0x437   :  { %v553_v60 = vpop.f32.mrf.mxu2 }
 0x438   :  { %v554_v53 = vadd.f32 %v553_v60, %v1099_v62  ;;  %v144_v60 = vadd.f32 %v142_v59, %v138_v24 }
 0x43a   :  { %v557_v63 = vadd.f32 %v554_v53, %v977_v3  ;;  %v145_v53 = vadd.f32 %v142_v59, %v139_v25 }
 0x43c   :  { %v559_v4 = vsel %vm91_vm9, %v557_v63, 0.0  ;;  %v569_v7 = vmul.f32 %v557_v63, %v557_v63 }
 0x43d   :  { %v560_v2 = vadd.f32 %v559_v4, %v558_v1 }
 0x43e   :  { %v571_v9 = vsel %vm91_vm9, %v569_v7, 0.0  ;;  %v818_v7 = vld [vmem:[%s1187_s2 + $0x28] sm:$0xff] }
 0x43f   :  { %v561_v11 = vrot.slane %v560_v2, 4  ;;  %v572_v62 = vadd.f32 %v571_v9, %v570_v8  ;;  %v1167_v8 = vperm.slane %v985_v5, 3 }
 0x441   :  { %v562_v12 = vadd.f32 %v561_v11, %v560_v2  ;;  %v573_v13 = vrot.slane %v572_v62, 4  ;;  %v817_v2 = vld [vmem:[%s1187_s2 + $0x20] sm:$0xff]  ;;  %738 = vrot.lane.b32.xlu0 %v1167_v8, %s927_s6 }
 0x443   :  { %v563_v3 = vrot.slane %v562_v12, 2  ;;  %v574_v15 = vadd.f32 %v573_v13, %v572_v62 }
 0x445   :  { %v564_v16 = vadd.f32 %v563_v3, %v562_v12  ;;  %v575_v17 = vrot.slane %v574_v15, 2 }
 0x447   :  { %v565_v18 = vrot.slane %v564_v16, 1  ;;  %v576_v20 = vadd.f32 %v575_v17, %v574_v15  ;;  %v673_v15 = vpop.permute.xlu2 %672 }
 0x449   :  { %v577_v22 = vrot.slane %v576_v20, 1  ;;  %v566_v23 = vadd.f32 %v565_v18, %v564_v16 }
 0x44b   :  { %v578_v27 = vadd.f32 %v577_v22, %v576_v20  ;;  %v567_v28 = vmul.f32 %v566_v23, %v1129_v54 }
 0x44d   :  { %v579_v6 = vmul.f32 %v578_v27, %v1129_v54  ;;  %v580_v43 = vmul.f32 %v567_v28, %v567_v28  ;;  %v582_v48 = vsub.f32 %v1134_v58, %v567_v28  ;;  %v583_v49 = vsub.f32 %v557_v63, %v567_v28  ;;  %v820_v63 = vld [vmem:[%s1187_s2 + $0x38] sm:$0xff]  ;;  %s936_s2 = smov [#allocation2]  }
 0x44e   :  { %683 = vmatpush.bf16.msrb.mxu1 %v820_v63  ;;  %s749_s24 = sshll.u32 %s936_s2, 4  ;;  %s750_s24 = int_to_ptr.vmem [resolvable:$true] %s749_s24 }
 0x44f   :  { %v581_v29 = vsub.f32 %v579_v6, %v580_v43 }
 0x451   :  { %v584_v31 = vadd.f32 1e-05, %v581_v29 }
 0x452   :  { %684 = vmatpush.bf16.msrb.mxu1 %v819_v55 }
 0x453   :  { %891 = vrsqrt.f32 %v584_v31  ;;  %vm591_vm15 = vweird.f32 %v584_v31 }
 0x456   :  { %685 = vmatpush.bf16.msrb.mxu1 %v818_v7 }
 0x459   :  { %v892_v34 = vpop.eup %891 }
 0x45a   :  { %v586_v35 = vmul.f32 %v892_v34, %v584_v31  ;;  %vm592_vm14 = vweird.f32 %v892_v34  ;;  %686 = vmatpush.bf16.msrb.mxu1 %v817_v2 }
 0x45b   :  { %vm593_vm1 = vmor %vm591_vm15, %vm592_vm14 }
 0x45c   :  { %v587_v37 = vmul.f32 %v892_v34, %v586_v35 }
 0x45e   :  { %v588_v38 = vmul.f32 0.5, %v587_v37 }
 0x460   :  { %v589_v44 = vsub.f32 1.5, %v588_v38 }
 0x462   :  { %v590_v45 = vmul.f32 %v892_v34, %v589_v44 }
 0x464   :  { %v594_v51 = vsel %vm593_vm1, %v892_v34, %v590_v45 }
 0x465   :  { %v595_v26 = vmul.f32 %v594_v51, %v582_v48  ;;  %v596_v56 = vmul.f32 %v594_v51, %v583_v49 }
 0x467   :  { %v600_v57 = vmul.f32 %v598_v50, %v595_v26  ;;  %v601_v52 = vmul.f32 %v598_v50, %v596_v56 }
 0x469   :  { %v605_v61 = vadd.f32 %v603_v14, %v600_v57  ;;  %v606_v0 = vadd.f32 %v603_v14, %v601_v52 }
 0x46b   :  { %v607_v1 = vadd.f32 %v605_v61, %v144_v60  ;;  %v608_v4 = vadd.f32 %v606_v0, %v145_v53 }
 0x46d   :  { %v609_v58 = vpack.c.bf16 %v608_v4, %v607_v1 }
 0x46f   :  { %794 = vmatmul.msk.bf16.vlgmr.msra.gmra.mxu3 %vm39_vm0, %v609_v58 }
 0x4b3   :  { %v739_v60 = vpop.permute.xlu0 %738 }
 0x4f2   :  { %v632_v9 = vpop.f32.mrf.mxu3 }
 0x4f3   :  { %v633_v11 = vadd.f32 %v632_v9, %v618_v10 }
 0x4f5   :  { %v637_v13 = vmax.f32 %v633_v11, 0.0 }
 0x4fa   :  { %v634_v62 = vpop.f32.mrf.mxu3 }
 0x4fb   :  { %v635_v12 = vadd.f32 %v634_v62, %v618_v10 }
 0x4fd   :  { %v638_v14 = vmax.f32 %v635_v12, 0.0 }
 0x4ff   :  { %v639_v3 = vpack.c.bf16 %v638_v14, %v637_v13 }
 0x501   :  { %811 = vmatmul.msk.bf16.vlgmr.msrb.gmra.mxu1 %vm675_vm2, %v639_v3 }
 0x57e   :  { %v688_v16 = vpop.f32.mrf.mxu1 }
 0x57f   :  { %v689_v17 = vadd.f32 %v688_v16, %v673_v15 }
 0x581   :  { %v693_v18 = vadd.f32 %v689_v17, %v607_v1 }
 0x583   :  { %v705_v21 = vmul.f32 %v693_v18, %v693_v18  ;;  %v695_v23 = vsel %vm39_vm0, %v693_v18, 0.0 }
 0x585   :  { %v707_v41 = vsel %vm39_vm0, %v705_v21, 0.0 }
 0x586   :  { %v690_v20 = vpop.f32.mrf.mxu1 }
 0x587   :  { %v691_v5 = vadd.f32 %v690_v20, %v673_v15 }
 0x589   :  { %v694_v22 = vadd.f32 %v691_v5, %v608_v4 }
 0x58b   :  { %v696_v27 = vsel %vm91_vm9, %v694_v22, 0.0  ;;  %v706_v28 = vmul.f32 %v694_v22, %v694_v22 }
 0x58c   :  { %v697_v19 = vadd.f32 %v696_v27, %v695_v23 }
 0x58d   :  { %v708_v6 = vsel %vm91_vm9, %v706_v28, 0.0 }
 0x58e   :  { %v698_v43 = vrot.slane %v697_v19, 4  ;;  %v709_v29 = vadd.f32 %v708_v6, %v707_v41 }
 0x590   :  { %v699_v30 = vadd.f32 %v698_v43, %v697_v19  ;;  %v710_v31 = vrot.slane %v709_v29, 4 }
 0x592   :  { %v700_v32 = vrot.slane %v699_v30, 2  ;;  %v711_v33 = vadd.f32 %v710_v31, %v709_v29 }
 0x594   :  { %v701_v34 = vadd.f32 %v700_v32, %v699_v30  ;;  %v712_v35 = vrot.slane %v711_v33, 2 }
 0x596   :  { %v702_v36 = vrot.slane %v701_v34, 1  ;;  %v713_v37 = vadd.f32 %v712_v35, %v711_v33 }
 0x598   :  { %v714_v38 = vrot.slane %v713_v37, 1  ;;  %v703_v39 = vadd.f32 %v702_v36, %v701_v34 }
 0x59a   :  { %v715_v40 = vadd.f32 %v714_v38, %v713_v37  ;;  %v704_v42 = vmul.f32 %v703_v39, %v1129_v54 }
 0x59c   :  { %v716_v44 = vmul.f32 %v715_v40, %v1129_v54  ;;  %v717_v45 = vmul.f32 %v704_v42, %v704_v42  ;;  %v719_v59 = vsub.f32 %v693_v18, %v704_v42  ;;  %v720_v24 = vsub.f32 %v694_v22, %v704_v42 }
 0x59e   :  { %v718_v46 = vsub.f32 %v716_v44, %v717_v45 }
 0x5a0   :  { %v721_v47 = vadd.f32 1e-05, %v718_v46 }
 0x5a2   :  { %893 = vrsqrt.f32 %v721_v47  ;;  %vm728_vm4 = vweird.f32 %v721_v47 }
 0x5a8   :  { %v894_v48 = vpop.eup %893 }
 0x5a9   :  { %v723_v49 = vmul.f32 %v894_v48, %v721_v47  ;;  %vm729_vm3 = vweird.f32 %v894_v48 }
 0x5aa   :  { %vm730_vm5 = vmor %vm728_vm4, %vm729_vm3 }
 0x5ab   :  { %v724_v50 = vmul.f32 %v894_v48, %v723_v49 }
 0x5ad   :  { %v725_v51 = vmul.f32 0.5, %v724_v50 }
 0x5af   :  { %v726_v26 = vsub.f32 1.5, %v725_v51 }
 0x5b1   :  { %v727_v56 = vmul.f32 %v894_v48, %v726_v26 }
 0x5b3   :  { %v731_v25 = vsel %vm730_vm5, %v894_v48, %v727_v56 }
 0x5b4   :  { %v732_v57 = vmul.f32 %v731_v25, %v719_v59  ;;  %v733_v52 = vmul.f32 %v731_v25, %v720_v24 }
 0x5b6   :  { %v735_v54 = vmul.f32 %v1167_v8, %v732_v57  ;;  %v736_v53 = vmul.f32 %v1167_v8, %v733_v52 }
 0x5b8   :  { %v741_v61 = vadd.f32 %v739_v60, %v735_v54  ;;  %v742_v0 = vadd.f32 %v739_v60, %v736_v53 }
 0x5ba   :  { %743 = vst.msk [vmem:[#allocation2] sm:$0xff] %vm39_vm0, %v741_v61 }
 0x5bb   :  { %744 = vst.msk [vmem:[#allocation2 + $0x8] sm:$0x3f] %vm91_vm9, %v742_v0 }
 0x5bc   :  { %757 = dma.vmem_to_hbm [thread:$0]  %s750_s24, 256, %s752_s26, [#allocation3], %s937_s27, %s937_s27, %s933_s10  }
 0x5bd   :  { %919 = dma.done.wait [#allocation3], 256  }
 0x5be   :  { %920 = vsyncadd [#allocation3], 4294967040 }
 0x5bf   :  { %762 = vsyncpa [#allocation3], 1 }

</bundles_post_ra>
